<compile_context>
chip_gen: v7x
topology: tpu7x:2x2x1
jax: 0.10.0
libtpu: 0.0.40
codegen_flags: <defaults>
</compile_context>

<pallas_src>
import jax
import jax.numpy as jnp
from jax.experimental import pallas as pl
from jax.experimental.pallas import tpu as pltpu


def _mlp_kernel_o1(x_ref, w1_ref, b1_ref, w2_ref, b2_ref, o_ref):
    """Fused linear1 -> ReLU -> linear2(O=1) -> sigmoid for one batch tile.

    x_ref : (TB, F)  VMEM tile (f32 or bf16)
    w1_ref: (F, H)   VMEM, resident (f32 or bf16)
    b1_ref: (1, H)   VMEM, resident, f32
    w2_ref: (1, H)   VMEM, resident, f32 (native PyTorch (out, in) layout)
    b2_ref: (1,)     SMEM, f32 scalar
    o_ref : (TB, 1)  VMEM tile, f32
    """
    x = x_ref[...]
    w1 = w1_ref[...]
    # linear1 on the MXU, accumulate in f32. Cast x to the weight dtype so a
    # bf16 w1 yields a bf16 x bf16 -> f32 MXU op (the VPU cast is ~free).
    h = jnp.dot(x.astype(w1.dtype), w1, preferred_element_type=jnp.float32)
    # bias + ReLU in f32 on the VPU.
    h = jnp.maximum(h + b1_ref[...], 0.0)
    # linear2 with output width 1: VPU multiply + XLU lane reduction instead
    # of a 1-column MXU matmul; b2 is a scalar read from SMEM.
    z = jnp.sum(h * w2_ref[...], axis=-1, keepdims=True) + b2_ref[0]
    o_ref[...] = jax.nn.sigmoid(z).astype(o_ref.dtype)


def _mlp_kernel_general(x_ref, w1_ref, b1_ref, w2_ref, b2_ref, o_ref):
    """General-O fallback (second layer on the MXU)."""
    x = x_ref[...]
    w1 = w1_ref[...]
    h = jnp.dot(x.astype(w1.dtype), w1, preferred_element_type=jnp.float32)
    h = jnp.maximum(h + b1_ref[...], 0.0)
    z = jnp.dot(h, w2_ref[...], preferred_element_type=jnp.float32)
    z = z + b2_ref[...]
    o_ref[...] = jax.nn.sigmoid(z).astype(o_ref.dtype)


def binary_classification_forward(x, w1, b1, w2, b2, *, block_b=512,
                                  matmul_dtype=jnp.bfloat16):
    """Forward pass of BinaryClassification.

    x : (B, F)
    w1: (F, H)   (pre-transposed relative to PyTorch's (H, F))
    b1: (1, H)
    w2: (O, H)   native PyTorch (out, in) layout
    b2: (O,)
    Returns (B, O) float32.
    """
    B, F = x.shape
    O, H = w2.shape
    assert w1.shape == (F, H) and b1.shape == (1, H) and b2.shape == (O,)

    # Cast the resident weight once; x tiles are cast inside the kernel.
    w1 = w1.astype(matmul_dtype)

    # Batch tiling. One grid step per TB rows; TB = 512 keeps per-step DMA
    # well above the ~0.35us step overhead and fits comfortably in VMEM on
    # every generation (2 x (512, F) f32 x-buffers + resident weights << 32MiB
    # scoped limit, including v7x's 64 MiB physical VMEM).
    if B <= block_b:
        tb, b_pad = B, B
    else:
        tb = block_b                      # multiple of 8 (and of 128)
        b_pad = pl.cdiv(B, tb) * tb
    if b_pad != B:
        x = jnp.pad(x, ((0, b_pad - B), (0, 0)))
    grid = (b_pad // tb,)

    def resident(shape):
        # Constant index_map -> block never changes -> stays in VMEM across
        # all grid steps (one DMA per call).
        return pl.BlockSpec(shape, lambda i: (0, 0))

    if O == 1:
        kernel = _mlp_kernel_o1
        in_specs = [
            pl.BlockSpec((tb, F), lambda i: (i, 0)),             # x tile
            resident((F, H)),                                    # w1
            resident((1, H)),                                    # b1
            resident((1, H)),                                    # w2 row
            pl.BlockSpec(memory_space=pltpu.MemorySpace.SMEM),   # b2 scalar
        ]
        operands = (x, w1, b1, w2, b2)
    else:
        kernel = _mlp_kernel_general
        in_specs = [
            pl.BlockSpec((tb, F), lambda i: (i, 0)),
            resident((F, H)),
            resident((1, H)),
            resident((H, O)),
            resident((1, O)),
        ]
        operands = (x, w1, b1, w2.T, b2.reshape(1, O))

    out = pl.pallas_call(
        kernel,
        out_shape=jax.ShapeDtypeStruct((b_pad, O), jnp.float32),
        grid=grid,
        in_specs=in_specs,
        out_specs=pl.BlockSpec((tb, O), lambda i: (i, 0)),
        compiler_params=pltpu.CompilerParams(
            # Batch tiles are independent: shard grid steps across both
            # TensorCores on v7x; harmless on single-TC v5e/v6e.
            dimension_semantics=("parallel",)),
    )(*operands)
    return out[:B]


def init_params(key, n_input_features, n_hidden_neurons, n_output_neurons):
    """Deterministic init mimicking nn.Linear's U(-1/sqrt(fan_in), ...).

    w1 is stored transposed ((in, hidden)) so the kernel uses x @ W1 directly;
    w2 keeps the native PyTorch (out, in) layout.
    """
    k1, k2, k3, k4 = jax.random.split(key, 4)
    lim1 = 1.0 / jnp.sqrt(jnp.float32(n_input_features))
    lim2 = 1.0 / jnp.sqrt(jnp.float32(n_hidden_neurons))
    w1 = jax.random.uniform(k1, (n_input_features, n_hidden_neurons),
                            jnp.float32, -lim1, lim1)
    b1 = jax.random.uniform(k2, (1, n_hidden_neurons), jnp.float32, -lim1, lim1)
    w2 = jax.random.uniform(k3, (n_output_neurons, n_hidden_neurons),
                            jnp.float32, -lim2, lim2)
    b2 = jax.random.uniform(k4, (n_output_neurons,), jnp.float32, -lim2, lim2)
    return w1, b1, w2, b2


def _reference(x, w1, b1, w2, b2):
    return jax.nn.sigmoid(jnp.maximum(x @ w1 + b1, 0.0) @ w2.T + b2)


if __name__ == "__main__":
    n_input_features = 32
    n_hidden_neurons = 32
    n_output_neurons = 1

    key = jax.random.PRNGKey(0)
    kx, kx2, kp = jax.random.split(key, 3)
    w1, b1, w2, b2 = init_params(kp, n_input_features, n_hidden_neurons,
                                 n_output_neurons)

    # Case 1: tiny batch (single block, grid of 1).
    x_small = jax.random.normal(kx, (8, n_input_features), jnp.float32)
    out_small = jax.block_until_ready(
        binary_classification_forward(x_small, w1, b1, w2, b2))
    ref_small = _reference(x_small, w1, b1, w2, b2)
    assert out_small.shape == (8, n_output_neurons)
    # bf16 matmul inputs (f32 accumulate) -> loosen tolerance vs f32 reference.
    assert jnp.allclose(out_small, ref_small, atol=2e-2, rtol=2e-2)

    # Case 2: batch that exercises the grid + padding path (3 steps of 512).
    x_big = jax.random.normal(kx2, (1037, n_input_features), jnp.float32)
    out_big = jax.block_until_ready(
        binary_classification_forward(x_big, w1, b1, w2, b2))
    ref_big = _reference(x_big, w1, b1, w2, b2)
    assert out_big.shape == (1037, n_output_neurons)
    assert jnp.allclose(out_big, ref_big, atol=2e-2, rtol=2e-2)

    # Exact-precision sanity check with f32 matmuls.
    out_f32 = jax.block_until_ready(
        binary_classification_forward(x_small, w1, b1, w2, b2,
                                      matmul_dtype=jnp.float32))
    assert jnp.allclose(out_f32, ref_small, atol=1e-5, rtol=1e-5)

    print("KERNEL_OK")
</pallas_src>

<mosaic_0001>
module attributes {stable_mosaic.version = 11 : i64} {
  func.func @_mlp_kernel_o1(%arg0: i32, %arg1: memref<8x32xf32, #tpu.memory_space<vmem>>, %arg2: memref<32x32xbf16, #tpu.memory_space<vmem>>, %arg3: memref<1x32xf32, #tpu.memory_space<vmem>>, %arg4: memref<1x32xf32, #tpu.memory_space<vmem>>, %arg5: memref<1xf32, #tpu.memory_space<smem>>, %arg6: memref<8x1xf32, #tpu.memory_space<vmem>>) attributes {dimension_semantics = [#tpu.dimension_semantics<parallel>], iteration_bounds = array<i64: 1>, scalar_prefetch = 0 : i64, scratch_operands = 0 : i64, tpu.core_type = #tpu.core_type<tc>, window_params = [{transform_indices = @transform_0, window_bounds = array<i64: 8, 32>}, {pipeline_mode = #tpu.pipeline_mode<synchronous>, transform_indices = @transform_1, window_bounds = array<i64: 32, 32>}, {pipeline_mode = #tpu.pipeline_mode<synchronous>, transform_indices = @transform_2, window_bounds = array<i64: 1, 32>}, {pipeline_mode = #tpu.pipeline_mode<synchronous>, transform_indices = @transform_3, window_bounds = array<i64: 1, 32>}, {transform_indices = @transform_4, window_bounds = array<i64: 1>}, {transform_indices = @transform_5, window_bounds = array<i64: 8, 1>}]} {
    %c0 = arith.constant 0 : index
    %c0_0 = arith.constant 0 : index
    %0 = vector.load %arg1[%c0, %c0_0] : memref<8x32xf32, #tpu.memory_space<vmem>>, vector<8x32xf32>
    %c0_1 = arith.constant 0 : index
    %c0_2 = arith.constant 0 : index
    %1 = vector.load %arg2[%c0_1, %c0_2] : memref<32x32xbf16, #tpu.memory_space<vmem>>, vector<32x32xbf16>
    %2 = arith.truncf %0 : vector<8x32xf32> to vector<8x32xbf16>
    %cst = arith.constant dense<0.000000e+00> : vector<8x32xf32>
    %3 = tpu.matmul %2, %1, %cst {dimension_numbers = #tpu.dot_dimension_numbers<[1], [0], [0], [1], [0, 0, 1, 1], [], []>} : vector<8x32xbf16>, vector<32x32xbf16>, vector<8x32xf32> -> vector<8x32xf32>
    %c0_3 = arith.constant 0 : index
    %c0_4 = arith.constant 0 : index
    %4 = vector.load %arg3[%c0_3, %c0_4] : memref<1x32xf32, #tpu.memory_space<vmem>>, vector<1x32xf32>
    %5 = vector.broadcast %4 : vector<1x32xf32> to vector<8x32xf32>
    %6 = arith.addf %3, %5 : vector<8x32xf32>
    %cst_5 = arith.constant 0.000000e+00 : f32
    %7 = vector.broadcast %cst_5 : f32 to vector<8x32xf32>
    %8 = arith.maximumf %6, %7 : vector<8x32xf32>
    %c0_6 = arith.constant 0 : index
    %c0_7 = arith.constant 0 : index
    %9 = vector.load %arg4[%c0_6, %c0_7] : memref<1x32xf32, #tpu.memory_space<vmem>>, vector<1x32xf32>
    %10 = vector.broadcast %9 : vector<1x32xf32> to vector<8x32xf32>
    %11 = arith.mulf %8, %10 : vector<8x32xf32>
    %cst_8 = arith.constant dense<0.000000e+00> : vector<8xf32>
    %12 = vector.multi_reduction <add>, %11, %cst_8 [1] : vector<8x32xf32> to vector<8xf32>
    %13 = vector.shape_cast %12 : vector<8xf32> to vector<8x1xf32>
    %c0_9 = arith.constant 0 : index
    %14 = memref.load %arg5[%c0_9] : memref<1xf32, #tpu.memory_space<smem>>
    %15 = vector.broadcast %14 : f32 to vector<8x1xf32>
    %16 = arith.addf %13, %15 : vector<8x1xf32>
    %17 = arith.negf %16 : vector<8x1xf32>
    %18 = math.exp %17 : vector<8x1xf32>
    %cst_10 = arith.constant 1.000000e+00 : f32
    %19 = vector.broadcast %cst_10 : f32 to vector<8x1xf32>
    %20 = arith.addf %19, %18 : vector<8x1xf32>
    %21 = arith.divf %19, %20 : vector<8x1xf32>
    %c0_11 = arith.constant 0 : index
    %c0_12 = arith.constant 0 : index
    %22 = vector.load %arg6[%c0_11, %c0_12] : memref<8x1xf32, #tpu.memory_space<vmem>>, vector<8x1xf32>
    tpu.vector_store %arg6[%c0_11, %c0_12], %21 {strides = array<i32>} : memref<8x1xf32, #tpu.memory_space<vmem>>, vector<8x1xf32>,
    return
  }
  func.func @transform_0(%arg0: i32) -> (i32, i32) {
    %c0_i32 = arith.constant 0 : i32
    %c0_i32_0 = arith.constant 0 : i32
    return %arg0, %c0_i32 : i32, i32
  }
  func.func @transform_1(%arg0: i32) -> (i32, i32) {
    %c0_i32 = arith.constant 0 : i32
    %c0_i32_0 = arith.constant 0 : i32
    %c0_i32_1 = arith.constant 0 : i32
    return %c0_i32, %c0_i32_0 : i32, i32
  }
  func.func @transform_2(%arg0: i32) -> (i32, i32) {
    %c0_i32 = arith.constant 0 : i32
    %c0_i32_0 = arith.constant 0 : i32
    %c0_i32_1 = arith.constant 0 : i32
    return %c0_i32, %c0_i32_0 : i32, i32
  }
  func.func @transform_3(%arg0: i32) -> (i32, i32) {
    %c0_i32 = arith.constant 0 : i32
    %c0_i32_0 = arith.constant 0 : i32
    %c0_i32_1 = arith.constant 0 : i32
    return %c0_i32, %c0_i32_0 : i32, i32
  }
  func.func @transform_4(%arg0: i32) -> i32 {
    %c0_i32 = arith.constant 0 : i32
    %c0_i32_0 = arith.constant 0 : i32
    return %c0_i32 : i32
  }
  func.func @transform_5(%arg0: i32) -> (i32, i32) {
    %c0_i32 = arith.constant 0 : i32
    %c0_i32_0 = arith.constant 0 : i32
    return %arg0, %c0_i32 : i32, i32
  }
}

</mosaic_0001>

<bundles_post_ra>
// kernel: tpu_custom_call.1
= control target key start
LH: loop header
LB: loop body
LE: loop exit
PB: predicated region body
PF: predicated region fallthrough
CT: control target
= control target key end

     0   :  { %11 = vsyncpa [#allocation4], 0  ;;  %s302_s0 = inlined_call_operand.hbm [shape: f32[8,32], index: 0, kind: input, shape index: {}]   ;;  %s303_s1 = inlined_call_operand.hbm [shape: bf16[32,32], index: 1, kind: input, shape index: {}]   ;;  %s304_s2 = inlined_call_operand.vmem [shape: f32[1,32], index: 2, kind: input, shape index: {}]   ;;  %s305_s3 = inlined_call_operand.vmem [shape: f32[1,32], index: 3, kind: input, shape index: {}]   ;;  %s306_s4 = inlined_call_operand.<no memory space> [shape: f32[1], index: 4, kind: input, shape index: {}]   ;;  %s307_s5 = inlined_call_operand.vmem [shape: f32[8,1], index: 5, kind: output, shape index: {}]  }
   0x1   :  { %12 = vsyncpa [#allocation6], 0  ;;  %s223_s18 = smov [#allocation3]   ;;  %s224_s20 = smov [#allocation5]  }
   0x2   :  { %s19_s19 = sshll.u32 %s223_s18, 4  ;;  %s28_s21 = sshll.u32 %s224_s20, 4  ;;  %s20_s19 = int_to_ptr.vmem [resolvable:$true] %s19_s19  ;;  %s259_s21 = int_to_ptr.vmem [resolvable:$true] %s28_s21 }
   0x3   :  { %s175_s24 = scalar_lea.hbm %s302_s0, 128 }
   0x4   :  { %p176_p0 = scmp.ne.s32.totalorder %s302_s0, %s175_s24  ;;  %p179_p1 = scmp.lt.u32.totalorder %s175_s24, %s302_s0 }
   0x6   :  { %p181_p2 = pnand %p179_p1, %p176_p0 }
   0x8   :  { %184 = shalt.err (!%p181_p2)
}
   0x9   :  { %s185_s29 = scalar_lea.vmem %s20_s19, 128  ;;  %p190_p4 = scmp.lt.s32.totalorder %s20_s19, %s20_s19 }
   0xa   :  { %p186_p3 = scmp.ne.s32.totalorder %s20_s19, %s185_s29  ;;  %p191_p5 = scmp.lt.s32.totalorder %s185_s29, %s185_s29 }
   0xc   :  { %p192_p6 = por %p191_p5, %p190_p4 }
   0xe   :  { %p193_p7 = pnand %p192_p6, %p186_p3 }
  0x10   :  { %196 = shalt.err (!%p193_p7)
}
  0x11   :  { %22 = dma.hbm_to_vmem [thread:$0]  %s302_s0, 128, %s20_s19, [#allocation4]  }
  0x12   :  { %s197_s9 = scalar_lea.hbm %s303_s1, 256 }
  0x13   :  { %p198_p8 = scmp.ne.s32.totalorder %s303_s1, %s197_s9  ;;  %p201_p9 = scmp.lt.u32.totalorder %s197_s9, %s303_s1 }
  0x15   :  { %p203_p10 = pnand %p201_p9, %p198_p8 }
  0x17   :  { %206 = shalt.err (!%p203_p10)
}
  0x18   :  { %s207_s14 = scalar_lea.vmem %s259_s21, 256  ;;  %p212_p12 = scmp.lt.s32.totalorder %s259_s21, %s259_s21 }
  0x19   :  { %p208_p11 = scmp.ne.s32.totalorder %s259_s21, %s207_s14  ;;  %p213_p13 = scmp.lt.s32.totalorder %s207_s14, %s207_s14 }
  0x1b   :  { %p214_p0 = por %p213_p13, %p212_p12 }
  0x1d   :  { %p215_p1 = pnand %p214_p0, %p208_p11 }
  0x1f   :  { %218 = shalt.err (!%p215_p1)
}
  0x20   :  { %s225_s0 = smov 64   ;;  %s226_s15 = smov 4  }
  0x21   :  { %34 = dma.hbm_to_vmem [thread:$0]  %s303_s1, 256, %s259_s21, [#allocation6], %s225_s0, %s225_s0, %s226_s15  }
  0x22   :  { %219 = dma.done.wait [#allocation4], 128  }
  0x23   :  { %220 = vsyncadd [#allocation4], 4294967168 }
  0x24   :  { %221 = dma.done.wait [#allocation6], 256  }
  0x25   :  { %222 = vsyncadd [#allocation6], 4294967040  ;;  %v227_v0 = vmov 0.0   ;;  %vm228_vm0 = vmmov 0   ;;  %v169_v1 = vld [vmem:[#allocation5] sm:$0xff]   ;;  %v170_v2 = vld [vmem:[#allocation5 + $0x8] sm:$0xff]   ;;  %v130_v15 = vstv %s306_s4 }
  0x26   :  { %155 = vmatprep.subr.bf16.mxu0 %v227_v0  ;;  %159 = vmatprep.mubr.msk.bf16.mxu0 %vm228_vm0, %v227_v0  ;;  %v48_v3 = vld [vmem:[#allocation3] sm:$0xff]  ;;  %vm73_vm1 = vcmask 261120   ;;  %vm138_vm2 = vcmask 7168  }
  0x27   :  { %156 = vmatpush3.bf16.msra.mxu0 %v169_v1  ;;  %v53_v4 = vpack.c.bf16 %v48_v3, %v48_v3  ;;  %v146_v5 = vld [vmem:[%s304_s2] ss:$0 sm:$0xff] }
  0x28   :  { %157 = vmatprep.subr.bf16.mxu0 %v227_v0  ;;  %v150_v10 = vld [vmem:[%s305_s3] ss:$0 sm:$0xff] }
  0x2b   :  { %158 = vmatpush3.bf16.msra.mxu0 %v170_v2 }
  0x2e   :  { %160 = vmatmul.mubr.msk.bf16.vlgmr.msra.gmra.mrb[0].mxu0 %vm73_vm1, %v53_v4 }
 0x101   :  { %v111_v6 = vpop.f32.mrb[0].mxu0 }
 0x102   :  { %v112_v7 = vadd.f32 %v146_v5, %v111_v6  ;;  %v161_v8 = vpop.f32.mrb[1].mxu0 }
 0x103   :  { %v114_v9 = vpop.f32.mrb[2].mxu0 }
 0x104   :  { %v117_v11 = vmax.f32 %v112_v7, 0.0  ;;  %v162_v12 = vpop.f32.mrb[3].mxu0 }
 0x106   :  { %v125_v13 = vmul.f32 %v150_v10, %v117_v11 }
 0x108   :  { %v126_v14 = vsel %vm73_vm1, %v125_v13, 0.0 }
 0x109   :  { %127 = vadd.xlane.f32.xlu0 %v126_v14 }
 0x196   :  { %v128_v16 = vpop.xlane.xlu0 %127 }
 0x197   :  { %v131_v17 = vadd.f32 %v130_v15, %v128_v16 }
 0x199   :  { %v151_v18 = vmul.f32 -1.442695, %v131_v17 }
 0x19b   :  { %171 = vpow2.f32 %v151_v18 }
 0x1a5   :  { %v172_v19 = vpop.eup %171 }
 0x1a6   :  { %v135_v20 = vadd.f32 1.0, %v172_v19 }
 0x1a8   :  { %173 = vrcp.f32 %v135_v20 }
 0x1b2   :  { %v174_v21 = vpop.eup %173 }
 0x1b3   :  { %139 = vst.msk [vmem:[%s307_s5] sm:$0xff] %vm138_vm2, %v174_v21 }
 0x1b4   :  { %144 = vsyncpa [#allocation4], 1 }
 0x1b5   :  { %145 = vsyncpa [#allocation6], 1 }

</bundles_post_ra>
